<compile_context>
chip_gen: v5e
topology: v5e:2x2
jax: 0.10.0
libtpu: 0.0.40
codegen_flags: <defaults>
</compile_context>

<pallas_src>
import functools

import jax
import jax.numpy as jnp
from jax import lax
from jax.experimental import pallas as pl
from jax.experimental.pallas import tpu as pltpu

LANES = 128            # lane width of a vreg
MAX_BLOCK_ROWS = 512   # sublane rows per grid step (512x128 f32 = 256 KiB / buffer)


def neighborhood_kernel(user_ref, movie_ref, ub_ref, mb_ref, gb_ref, out_ref,
                        *, num_users, num_movies):
    """out[r, l] = gb + ub[user[r, l]] + mb[movie[r, l]] via vectorized select-sum.

    user_ref / movie_ref: (block_rows, 128) int32 VMEM tiles of indices.
    ub_ref (num_users,), mb_ref (num_movies,), gb_ref (1,): f32 SMEM tables.
    out_ref: (block_rows, 128) f32 VMEM tile (lane-dense store).
    """
    # In-kernel clamp keeps every table read in range (nn.Embedding would raise
    # on OOB; clamping is documented behavior here).
    u = jnp.clip(user_ref[...], 0, num_users - 1)
    m = jnp.clip(movie_ref[...], 0, num_movies - 1)

    acc = jnp.full(u.shape, gb_ref[0], dtype=jnp.float32)

    def add_user(n, a):
        return a + jnp.where(u == n, ub_ref[n], 0.0)

    def add_movie(n, a):
        return a + jnp.where(m == n, mb_ref[n], 0.0)

    acc = lax.fori_loop(0, num_users, add_user, acc)
    acc = lax.fori_loop(0, num_movies, add_movie, acc)

    out_ref[...] = acc


def neighborhood_forward(user, movie, user_bias_table, movie_bias_table, global_bias):
    """Pallas-backed equivalent of NeighborhoodModel.forward."""
    B = user.shape[0]
    nu = int(user_bias_table.shape[0])
    nm = int(movie_bias_table.shape[0])

    # Pad the batch to a lane-dense 2-D layout (rows, 128), rows a multiple of 8.
    rows_needed = max(1, -(-B // LANES))
    if rows_needed >= MAX_BLOCK_ROWS:
        block_rows = MAX_BLOCK_ROWS
        rows = -(-rows_needed // MAX_BLOCK_ROWS) * MAX_BLOCK_ROWS
    else:
        block_rows = -(-rows_needed // 8) * 8
        rows = block_rows
    n_tiles = rows // block_rows
    b_pad = rows * LANES

    # Single padding pass; padded lanes hold index 0 and are discarded below.
    user_i = jnp.pad(user.astype(jnp.int32), (0, b_pad - B)).reshape(rows, LANES)
    movie_i = jnp.pad(movie.astype(jnp.int32), (0, b_pad - B)).reshape(rows, LANES)

    ub = user_bias_table.astype(jnp.float32).reshape(nu)
    mb = movie_bias_table.astype(jnp.float32).reshape(nm)
    gb = global_bias.astype(jnp.float32).reshape(1)

    kernel = functools.partial(neighborhood_kernel, num_users=nu, num_movies=nm)
    smem = lambda: pl.BlockSpec(memory_space=pltpu.SMEM)

    out = pl.pallas_call(
        kernel,
        grid=(n_tiles,),
        out_shape=jax.ShapeDtypeStruct((rows, LANES), jnp.float32),
        in_specs=[
            pl.BlockSpec((block_rows, LANES), lambda i: (i, 0)),  # user indices (VMEM)
            pl.BlockSpec((block_rows, LANES), lambda i: (i, 0)),  # movie indices (VMEM)
            smem(),  # user bias table
            smem(),  # movie bias table
            smem(),  # global bias
        ],
        out_specs=pl.BlockSpec((block_rows, LANES), lambda i: (i, 0)),
        compiler_params=pltpu.CompilerParams(
            # Each grid step owns a disjoint output block -> batch axis is parallel
            # (megacore sharding on v7x, neutral on v5e/v6e).
            dimension_semantics=("parallel",),
        ),
    )(user_i, movie_i, ub, mb, gb)

    # torch: prediction.squeeze() on (B, 1) -> (B,)
    return out.reshape(b_pad)[:B]


if __name__ == "__main__":
    num_users, num_movies, batch = 16, 32, 8

    key = jax.random.PRNGKey(0)
    k_ub, k_mb, k_u, k_m = jax.random.split(key, 4)

    # nn.Embedding(num, 1) default init ~ N(0, 1); global_bias initialized to zeros.
    user_bias_table = jax.random.normal(k_ub, (num_users, 1), dtype=jnp.float32)
    movie_bias_table = jax.random.normal(k_mb, (num_movies, 1), dtype=jnp.float32)
    global_bias = jnp.zeros((1,), dtype=jnp.float32)

    user = jax.random.randint(k_u, (batch,), 0, num_users, dtype=jnp.int32)
    movie = jax.random.randint(k_m, (batch,), 0, num_movies, dtype=jnp.int32)

    pred = neighborhood_forward(user, movie, user_bias_table, movie_bias_table, global_bias)
    pred = jax.block_until_ready(pred)

    # Pure-JAX reference for correctness check.
    ref = global_bias[0] + user_bias_table[user, 0] + movie_bias_table[movie, 0]
    assert pred.shape == (batch,)
    assert jnp.allclose(pred, ref, atol=1e-6), (pred, ref)

    print("KERNEL_OK")
</pallas_src>

<mosaic_0001>
module attributes {stable_mosaic.version = 11 : i64} {
  func.func @neighborhood_kernel(%arg0: i32, %arg1: memref<8x128xi32, #tpu.memory_space<vmem>>, %arg2: memref<8x128xi32, #tpu.memory_space<vmem>>, %arg3: memref<16xf32, #tpu.memory_space<smem>>, %arg4: memref<32xf32, #tpu.memory_space<smem>>, %arg5: memref<1xf32, #tpu.memory_space<smem>>, %arg6: memref<8x128xf32, #tpu.memory_space<vmem>>) attributes {dimension_semantics = [#tpu.dimension_semantics<parallel>], iteration_bounds = array<i64: 1>, scalar_prefetch = 0 : i64, scratch_operands = 0 : i64, tpu.core_type = #tpu.core_type<tc>, window_params = [{transform_indices = @transform_0, window_bounds = array<i64: 8, 128>}, {transform_indices = @transform_1, window_bounds = array<i64: 8, 128>}, {transform_indices = @transform_2, window_bounds = array<i64: 16>}, {transform_indices = @transform_3, window_bounds = array<i64: 32>}, {transform_indices = @transform_4, window_bounds = array<i64: 1>}, {transform_indices = @transform_5, window_bounds = array<i64: 8, 128>}]} {
    %c0 = arith.constant 0 : index
    %c0_0 = arith.constant 0 : index
    %0 = vector.load %arg1[%c0, %c0_0] : memref<8x128xi32, #tpu.memory_space<vmem>>, vector<8x128xi32>
    %c0_i32 = arith.constant 0 : i32
    %c15_i32 = arith.constant 15 : i32
    %1 = vector.broadcast %c0_i32 : i32 to vector<8x128xi32>
    %2 = arith.maxsi %1, %0 : vector<8x128xi32>
    %3 = vector.broadcast %c15_i32 : i32 to vector<8x128xi32>
    %4 = arith.minsi %3, %2 : vector<8x128xi32>
    %c0_1 = arith.constant 0 : index
    %c0_2 = arith.constant 0 : index
    %5 = vector.load %arg2[%c0_1, %c0_2] : memref<8x128xi32, #tpu.memory_space<vmem>>, vector<8x128xi32>
    %c0_i32_3 = arith.constant 0 : i32
    %c31_i32 = arith.constant 31 : i32
    %6 = vector.broadcast %c0_i32_3 : i32 to vector<8x128xi32>
    %7 = arith.maxsi %6, %5 : vector<8x128xi32>
    %8 = vector.broadcast %c31_i32 : i32 to vector<8x128xi32>
    %9 = arith.minsi %8, %7 : vector<8x128xi32>
    %c0_4 = arith.constant 0 : index
    %10 = memref.load %arg5[%c0_4] : memref<1xf32, #tpu.memory_space<smem>>
    %11 = vector.broadcast %10 : f32 to vector<8x128xf32>
    %c0_i32_5 = arith.constant 0 : i32
    %c16_i32 = arith.constant 16 : i32
    %12 = arith.addi %c0_i32_5, %c16_i32 : i32
    %c1_i32 = arith.constant 1 : i32
    %13 = scf.for %arg7 = %c0_i32_5 to %12 step %c1_i32 iter_args(%arg8 = %11) -> (vector<8x128xf32>)  : i32 {
      %17 = vector.broadcast %arg7 : i32 to vector<8x128xi32>
      %18 = arith.cmpi eq, %4, %17 : vector<8x128xi32>
      %19 = arith.index_cast %arg7 : i32 to index
      %20 = memref.load %arg3[%19] : memref<16xf32, #tpu.memory_space<smem>>
      %cst = arith.constant 0.000000e+00 : f32
      %21 = vector.broadcast %20 : f32 to vector<8x128xf32>
      %22 = vector.broadcast %cst : f32 to vector<8x128xf32>
      %23 = arith.select %18, %21, %22 : vector<8x128xi1>, vector<8x128xf32>
      %24 = arith.addf %arg8, %23 : vector<8x128xf32>
      scf.yield %24 : vector<8x128xf32>
    }
    %c16_i32_6 = arith.constant 16 : i32
    %c0_i32_7 = arith.constant 0 : i32
    %c32_i32 = arith.constant 32 : i32
    %14 = arith.addi %c0_i32_7, %c32_i32 : i32
    %c1_i32_8 = arith.constant 1 : i32
    %15 = scf.for %arg7 = %c0_i32_7 to %14 step %c1_i32_8 iter_args(%arg8 = %13) -> (vector<8x128xf32>)  : i32 {
      %17 = vector.broadcast %arg7 : i32 to vector<8x128xi32>
      %18 = arith.cmpi eq, %9, %17 : vector<8x128xi32>
      %19 = arith.index_cast %arg7 : i32 to index
      %20 = memref.load %arg4[%19] : memref<32xf32, #tpu.memory_space<smem>>
      %cst = arith.constant 0.000000e+00 : f32
      %21 = vector.broadcast %20 : f32 to vector<8x128xf32>
      %22 = vector.broadcast %cst : f32 to vector<8x128xf32>
      %23 = arith.select %18, %21, %22 : vector<8x128xi1>, vector<8x128xf32>
      %24 = arith.addf %arg8, %23 : vector<8x128xf32>
      scf.yield %24 : vector<8x128xf32>
    }
    %c32_i32_9 = arith.constant 32 : i32
    %c0_10 = arith.constant 0 : index
    %c0_11 = arith.constant 0 : index
    %16 = vector.load %arg6[%c0_10, %c0_11] : memref<8x128xf32, #tpu.memory_space<vmem>>, vector<8x128xf32>
    tpu.vector_store %arg6[%c0_10, %c0_11], %15 {strides = array<i32>} : memref<8x128xf32, #tpu.memory_space<vmem>>, vector<8x128xf32>,
    return
  }
  func.func @transform_0(%arg0: i32) -> (i32, i32) {
    %c0_i32 = arith.constant 0 : i32
    %c0_i32_0 = arith.constant 0 : i32
    return %arg0, %c0_i32 : i32, i32
  }
  func.func @transform_1(%arg0: i32) -> (i32, i32) {
    %c0_i32 = arith.constant 0 : i32
    %c0_i32_0 = arith.constant 0 : i32
    return %arg0, %c0_i32 : i32, i32
  }
  func.func @transform_2(%arg0: i32) -> i32 {
    %c0_i32 = arith.constant 0 : i32
    %c0_i32_0 = arith.constant 0 : i32
    return %c0_i32 : i32
  }
  func.func @transform_3(%arg0: i32) -> i32 {
    %c0_i32 = arith.constant 0 : i32
    %c0_i32_0 = arith.constant 0 : i32
    return %c0_i32 : i32
  }
  func.func @transform_4(%arg0: i32) -> i32 {
    %c0_i32 = arith.constant 0 : i32
    %c0_i32_0 = arith.constant 0 : i32
    return %c0_i32 : i32
  }
  func.func @transform_5(%arg0: i32) -> (i32, i32) {
    %c0_i32 = arith.constant 0 : i32
    %c0_i32_0 = arith.constant 0 : i32
    return %arg0, %c0_i32 : i32, i32
  }
}

</mosaic_0001>

<bundles_post_ra>
// kernel: tpu_custom_call.1
= control target key start
LH: loop header
LB: loop body
LE: loop exit
PB: predicated region body
PF: predicated region fallthrough
CT: control target
= control target key end

     0   :  { %11 = vsyncpa [#allocation4], 0  ;;  %s378_s0 = inlined_call_operand.hbm [shape: s32[8,128], index: 0, kind: input, shape index: {}]   ;;  %s379_s1 = inlined_call_operand.hbm [shape: s32[8,128], index: 1, kind: input, shape index: {}]   ;;  %s380_s2 = inlined_call_operand.vmem [shape: f32[16], index: 2, kind: input, shape index: {}]   ;;  %s381_s3 = inlined_call_operand.vmem [shape: f32[32], index: 3, kind: input, shape index: {}]   ;;  %s382_s4 = inlined_call_operand.<no memory space> [shape: f32[1], index: 4, kind: input, shape index: {}]   ;;  %s383_s5 = inlined_call_operand.hbm [shape: f32[8,128], index: 5, kind: output, shape index: {}]  }
   0x1   :  { %12 = vsyncpa [#allocation8], 0 }
   0x2   :  { %13 = vsyncpa [#allocation6], 0 }
   0x3   :  { %14 = vsyncpa [#allocation11], 0 }
   0x4   :  { %15 = vsyncpa [#allocation5], 0  ;;  %s21_s20 = sshll.u32 %s378_s0, 4  ;;  %s325_s21 = smov [#allocation3]   ;;  %s22_s20 = int_to_ptr.hbm [resolvable:$true] %s21_s20 }
   0x5   :  { %s23_s22 = sshll.u32 %s325_s21, 4  ;;  %s32_s25 = sshll.u32 %s379_s1, 4  ;;  %s24_s22 = int_to_ptr.vmem [resolvable:$true] %s23_s22  ;;  %s33_s25 = int_to_ptr.hbm [resolvable:$true] %s32_s25 }
   0x6   :  { %26 = dma.hbm_to_vmem [thread:$0]  %s22_s20, 128, %s24_s22, [#allocation4]  }
   0x7   :  { %s326_s26 = smov [#allocation7]   ;;  %s43_s30 = sshll.u32 %s380_s2, 4  ;;  %s44_s30 = int_to_ptr.vmem [resolvable:$true] %s43_s30 }
   0x8   :  { %s34_s27 = sshll.u32 %s326_s26, 4  ;;  %s52_s7 = sshll.u32 %s381_s3, 4  ;;  %s35_s27 = int_to_ptr.vmem [resolvable:$true] %s34_s27  ;;  %s53_s7 = int_to_ptr.vmem [resolvable:$true] %s52_s7 }
   0x9   :  { %37 = dma.hbm_to_vmem [thread:$0]  %s33_s25, 128, %s35_s27, [#allocation8]  }
   0xa   :  { %s327_s8 = smov [#allocation9]   ;;  %s328_s9 = smov [#allocation10]  }
   0xb   :  { %46 = dma.vmem_to_smem %s44_s30, 16, %s327_s8, [#allocation6]  }
   0xc   :  { %55 = dma.vmem_to_smem %s53_s7, 16, %s328_s9, [#allocation11]  }
   0xd   :  { %299 = dma.done.wait [#allocation4], 128  }
   0xe   :  { %300 = vsyncadd [#allocation4], 4294967168 }
   0xf   :  { %301 = dma.done.wait [#allocation8], 128  }
  0x10   :  { %302 = vsyncadd [#allocation8], 4294967168 }
  0x11   :  { %303 = dma.done.wait [#allocation6], 16  }
  0x12   :  { %304 = vsyncadd [#allocation6], 4294967280 }
  0x13   :  { %305 = dma.done.wait [#allocation11], 16  }
  0x14   :  { %306 = vsyncadd [#allocation11], 4294967280 }
  0x15   :  { %74 = sfence }
  0x16   :  { %v75_v0 = vld [vmem:[#allocation3] sm:$0xff]  ;;  %v80_v1 = vld [vmem:[#allocation7] sm:$0xff]  ;;  %v86_v2 = vstv %s382_s4   ;;  %s313_s3 = smov 0  }
  0x17   :  { %vm76_vm0 = vcmp.gt.s32.totalorder %v75_v0, 0  ;;  %vm81_vm1 = vcmp.gt.s32.totalorder %v80_v1, 0  ;;  %v309_v7 = vmov %v86_v2  }
  0x18   :  { %v77_v3 = vsel %vm76_vm0, %v75_v0, 0  ;;  %v82_v4 = vsel %vm81_vm1, %v80_v1, 0 }
  0x19   :  { %vm78_vm2 = vcmp.lt.s32.totalorder %v77_v3, 15  ;;  %vm83_vm3 = vcmp.lt.s32.totalorder %v82_v4, 31 }
  0x1a   :  { %v79_v5 = vsel %vm78_vm2, %v77_v3, 15  ;;  %v84_v6 = vsel %vm83_vm3, %v82_v4, 31 }
  0x1b LB: > { %s96_s10 = sld [smem:[#allocation9 + %s315_s3]]  ;;  %v94_v8 = vstv %s315_s3  ;;  %s92_s3 = sadd.s32 1, %s315_s3   ;;  %s315_s3 = sphi %s313_s3, %s92_s3   ;;  %v311_v7 = vphi %v309_v7, %v310_v7  }
  0x1c   : > { %vm95_vm4 = vcmp.eq.s32.totalorder %v79_v5, %v94_v8  ;;  %p89_p0 = scmp.ge.s32.totalorder %s92_s3, 16  }
  0x1d   :  { %s321_s4 = smov (%p89_p0), 0  }
  0x21   : > { %v97_v9 = vstv %s96_s10  ;;  %91 = sbr.rel (!%p89_p0) target bundleno = 27 (0x1b), region = 70 }
  0x22   : > { %v98_v10 = vsel %vm95_vm4, %v97_v9, 0.0 }
  0x23   : > { %v99_v11 = vadd.f32 %v311_v7, %v98_v10  }
  0x25   : > { %v310_v7 = vmov %v99_v11   ;;  %v317_v12 = vmov (%p89_p0), %v99_v11  }
  0x26 LB: > { %s109_s11 = sld [smem:[#allocation10 + %s323_s4]]  ;;  %v107_v13 = vstv %s323_s4  ;;  %s105_s4 = sadd.s32 1, %s323_s4   ;;  %s323_s4 = sphi %s321_s4, %s105_s4   ;;  %v319_v12 = vphi %v317_v12, %v318_v12  }
  0x27   : > { %vm108_vm5 = vcmp.eq.s32.totalorder %v84_v6, %v107_v13  ;;  %p102_p1 = scmp.ge.s32.totalorder %s105_s4, 32  }
  0x28   :  { %s121_s14 = sshll.u32 (%p102_p1), %s383_s5, 4  ;;  %s329_s15 = smov (%p102_p1), [#allocation12]   ;;  %s122_s14 = int_to_ptr.hbm [resolvable:$true] %s121_s14 }
  0x29   :  { %s119_s16 = sshll.u32 (%p102_p1), %s329_s15, 4  ;;  %s120_s16 = int_to_ptr.vmem [resolvable:$true] %s119_s16 }
  0x2c   : > { %v110_v14 = vstv %s109_s11  ;;  %104 = sbr.rel (!%p102_p1) target bundleno = 38 (0x26), region = 81 }
  0x2d   : > { %v111_v15 = vsel %vm108_vm5, %v110_v14, 0.0 }
  0x2e   : > { %v112_v16 = vadd.f32 %v319_v12, %v111_v15  }
  0x30   : > { %v318_v12 = vmov %v112_v16   ;;  %113 = vst [vmem:[#allocation12] sm:$0xff] (%p102_p1), %v112_v16 }
  0x31   :  { %124 = dma.vmem_to_hbm [thread:$0]  %s120_s16, 128, %s122_s14, [#allocation5]  }
  0x32   :  { %307 = dma.done.wait [#allocation5], 128  }
  0x33   :  { %308 = vsyncadd [#allocation5], 4294967168 }
  0x34   :  { %129 = vsyncpa [#allocation4], 1 }
  0x35   :  { %130 = vsyncpa [#allocation8], 1 }
  0x36   :  { %131 = vsyncpa [#allocation5], 1 }
  0x37   :  { %132 = vsyncpa [#allocation6], 1 }
  0x38   :  { %133 = vsyncpa [#allocation11], 1 }

</bundles_post_ra>
